<compile_context>
chip_gen: v7x
topology: tpu7x:2x2x1
jax: 0.10.0
libtpu: 0.0.40
codegen_flags: <defaults>
</compile_context>

<pallas_src>
import jax
import jax.numpy as jnp
from jax.experimental import pallas as pl
from jax.experimental.pallas import tpu as pltpu


def _normalize_kernel(x_ref, mean_ref, inv_std_ref, o_ref):
    # x_ref: (TR, TCOL) activation tile; mean_ref / inv_std_ref: (TR, 1)
    # per-row params in the same dtype. Pure VPU sub + mul with (TR, 1)
    # columns broadcast across the lane axis.
    o_ref[...] = (x_ref[...] - mean_ref[...]) * inv_std_ref[...]


def wrapper_model_forward(x, mean, std, model_fn=None):
    """JAX/Pallas equivalent of WrapperModel.forward.

    x:    (N, C, H, W) activation (NCHW, same as PyTorch)
    mean: (C,) per-channel mean
    std:  (C,) per-channel std
    model_fn: the wrapped `self.model` (user-supplied callable applied to the
              normalized tensor); identity stand-in if None.
    """
    N, C, H, W = x.shape
    R, HW = N * C, H * W
    dtype = x.dtype
    itemsize = jnp.dtype(dtype).itemsize
    sub = max(8, 8 * (4 // itemsize))      # sublane packing: 8 f32, 16 bf16

    # ---- layout: lane-dense 2-D slab (no pad / no post-slice) -------------
    x2 = x.reshape(R, HW)

    # ---- per-row normalization params, exact f32 reciprocal, x dtype ------
    mean_col = jnp.tile(jnp.asarray(mean, jnp.float32), N).reshape(R, 1)
    inv_col = jnp.tile(1.0 / jnp.asarray(std, jnp.float32), N).reshape(R, 1)
    mean_col = mean_col.astype(dtype)
    inv_col = inv_col.astype(dtype)

    # ---- adaptive tile sizing (target ~4 MiB blocks; mem-bound) -----------
    target_bytes = 4 * 1024 * 1024
    if HW <= 2048:
        TCOL = HW                           # full-extent lane axis (always legal)
    else:
        TCOL = 2048                         # multiple of 128; tail tile -> masked vst
    rows_for_target = max(1, target_bytes // (TCOL * itemsize))
    if rows_for_target >= R:
        TR = R                              # full extent (no sublane constraint)
    else:
        TR = max(sub, (rows_for_target // sub) * sub)
    grid_r, grid_c = pl.cdiv(R, TR), pl.cdiv(HW, TCOL)
    # v7x megacore: prefer >= 2 blocks along a parallel axis when possible.
    if grid_r == 1 and grid_c == 1 and R >= 2 * sub:
        TR = ((pl.cdiv(R, 2) + sub - 1) // sub) * sub
        grid_r = pl.cdiv(R, TR)
    grid = (grid_r, grid_c)

    normalized = pl.pallas_call(
        _normalize_kernel,
        out_shape=jax.ShapeDtypeStruct((R, HW), dtype),
        grid_spec=pl.GridSpec(
            grid=grid,
            in_specs=[
                pl.BlockSpec((TR, TCOL), lambda i, j: (i, j)),
                # Per-tile param blocks: tiny VMEM, pipelined like any input.
                pl.BlockSpec((TR, 1), lambda i, j: (i, 0)),
                pl.BlockSpec((TR, 1), lambda i, j: (i, 0)),
            ],
            out_specs=pl.BlockSpec((TR, TCOL), lambda i, j: (i, j)),
        ),
        compiler_params=pltpu.CompilerParams(
            dimension_semantics=("parallel", "parallel"),
            vmem_limit_bytes=40 * 1024 * 1024,
        ),
        # x2 and the output are identical in shape/dtype: donate the slab.
        input_output_aliases={0: 0},
    )(x2, mean_col, inv_col)

    normalized = normalized.reshape(N, C, H, W)

    # TODO(synk): `self.model` is an arbitrary user-supplied module passed to
    # WrapperModel.__init__ and is opaque here. The largest remaining win is
    # fusing (x - mean) * inv_std into that model's first matmul/conv kernel
    # (apply to the A-tile after its VMEM load), eliminating this kernel's
    # HBM round-trip entirely.
    if model_fn is None:
        return normalized
    return model_fn(normalized)


if __name__ == "__main__":
    key = jax.random.PRNGKey(0)
    N, C, H, W = 2, 4, 16, 16

    x = jax.random.normal(key, (N, C, H, W), dtype=jnp.float32)
    # Deterministic per-channel normalization params (ImageNet-style + pad).
    mean = jnp.array([0.485, 0.456, 0.406, 0.500], dtype=jnp.float32)
    std = jnp.array([0.229, 0.224, 0.225, 0.250], dtype=jnp.float32)

    out = wrapper_model_forward(x, mean, std)
    out = jax.block_until_ready(out)

    # Reference (plain JAX) check of the wrapper semantics.
    ref = (x - mean[None, :, None, None]) / std[None, :, None, None]
    assert out.shape == (N, C, H, W)
    assert out.dtype == x.dtype
    assert jnp.allclose(out, ref, atol=1e-5, rtol=1e-5)

    print("KERNEL_OK")
</pallas_src>

<mosaic_0001>
module attributes {stable_mosaic.version = 11 : i64} {
  func.func @_normalize_kernel(%arg0: i32, %arg1: i32, %arg2: memref<8x256xf32, #tpu.memory_space<vmem>>, %arg3: memref<8x1xf32, #tpu.memory_space<vmem>>, %arg4: memref<8x1xf32, #tpu.memory_space<vmem>>, %arg5: memref<8x256xf32, #tpu.memory_space<vmem>>) attributes {dimension_semantics = [#tpu.dimension_semantics<parallel>, #tpu.dimension_semantics<parallel>], iteration_bounds = array<i64: 1, 1>, scalar_prefetch = 0 : i64, scratch_operands = 0 : i64, tpu.core_type = #tpu.core_type<tc>, window_params = [{transform_indices = @transform_0, window_bounds = array<i64: 8, 256>}, {transform_indices = @transform_1, window_bounds = array<i64: 8, 1>}, {transform_indices = @transform_2, window_bounds = array<i64: 8, 1>}, {transform_indices = @transform_3, window_bounds = array<i64: 8, 256>}]} {
    %c0 = arith.constant 0 : index
    %c0_0 = arith.constant 0 : index
    %0 = vector.load %arg2[%c0, %c0_0] : memref<8x256xf32, #tpu.memory_space<vmem>>, vector<8x256xf32>
    %c0_1 = arith.constant 0 : index
    %c0_2 = arith.constant 0 : index
    %1 = vector.load %arg3[%c0_1, %c0_2] : memref<8x1xf32, #tpu.memory_space<vmem>>, vector<8x1xf32>
    %2 = vector.broadcast %1 : vector<8x1xf32> to vector<8x256xf32>
    %3 = arith.subf %0, %2 : vector<8x256xf32>
    %c0_3 = arith.constant 0 : index
    %c0_4 = arith.constant 0 : index
    %4 = vector.load %arg4[%c0_3, %c0_4] : memref<8x1xf32, #tpu.memory_space<vmem>>, vector<8x1xf32>
    %5 = vector.broadcast %4 : vector<8x1xf32> to vector<8x256xf32>
    %6 = arith.mulf %3, %5 : vector<8x256xf32>
    %c0_5 = arith.constant 0 : index
    %c0_6 = arith.constant 0 : index
    %7 = vector.load %arg5[%c0_5, %c0_6] : memref<8x256xf32, #tpu.memory_space<vmem>>, vector<8x256xf32>
    tpu.vector_store %arg5[%c0_5, %c0_6], %6 {strides = array<i32>} : memref<8x256xf32, #tpu.memory_space<vmem>>, vector<8x256xf32>,
    return
  }
  func.func @transform_0(%arg0: i32, %arg1: i32) -> (i32, i32) {
    %c0_i32 = arith.constant 0 : i32
    return %arg0, %arg1 : i32, i32
  }
  func.func @transform_1(%arg0: i32, %arg1: i32) -> (i32, i32) {
    %c0_i32 = arith.constant 0 : i32
    %c0_i32_0 = arith.constant 0 : i32
    return %arg0, %c0_i32 : i32, i32
  }
  func.func @transform_2(%arg0: i32, %arg1: i32) -> (i32, i32) {
    %c0_i32 = arith.constant 0 : i32
    %c0_i32_0 = arith.constant 0 : i32
    return %arg0, %c0_i32 : i32, i32
  }
  func.func @transform_3(%arg0: i32, %arg1: i32) -> (i32, i32) {
    %c0_i32 = arith.constant 0 : i32
    return %arg0, %arg1 : i32, i32
  }
}

</mosaic_0001>

<bundles_post_ra>
// kernel: tpu_custom_call.1
= control target key start
LH: loop header
LB: loop body
LE: loop exit
PB: predicated region body
PF: predicated region fallthrough
CT: control target
= control target key end

     0   :  { %8 = vsyncpa [#allocation3], 0  ;;  %s167_s0 = inlined_call_operand.hbm [shape: f32[8,256], index: 0, kind: input, shape index: {}, may-alias: {0,3}]   ;;  %s168_s1 = inlined_call_operand.vmem [shape: f32[8,1], index: 1, kind: input, shape index: {}]   ;;  %s169_s2 = inlined_call_operand.vmem [shape: f32[8,1], index: 2, kind: input, shape index: {}]   ;;  %s170_s3 = inlined_call_operand.hbm [shape: f32[8,256], index: 3, kind: output, shape index: {}, may-alias: {0,3}]  }
   0x1   :  { %9 = vsyncpa [#allocation4], 0  ;;  %s114_s12 = smov [#allocation2]   ;;  %s66_s16 = scalar_lea.hbm %s167_s0, 256 }
   0x2   :  { %s16_s13 = sshll.u32 %s114_s12, 4  ;;  %p67_p0 = scmp.ne.s32.totalorder %s167_s0, %s66_s16  ;;  %s17_s13 = int_to_ptr.vmem [resolvable:$true] %s16_s13 }
   0x3   :  { %p70_p1 = scmp.lt.u32.totalorder %s66_s16, %s167_s0 }
   0x5   :  { %p72_p2 = pnand %p70_p1, %p67_p0 }
   0x7   :  { %75 = shalt.err (!%p72_p2)
}
   0x8   :  { %s76_s21 = scalar_lea.vmem %s17_s13, 256  ;;  %p81_p4 = scmp.lt.s32.totalorder %s17_s13, %s17_s13 }
   0x9   :  { %p77_p3 = scmp.ne.s32.totalorder %s17_s13, %s76_s21  ;;  %p82_p5 = scmp.lt.s32.totalorder %s76_s21, %s76_s21 }
   0xb   :  { %p83_p6 = por %p82_p5, %p81_p4 }
   0xd   :  { %p84_p7 = pnand %p83_p6, %p77_p3 }
   0xf   :  { %87 = shalt.err (!%p84_p7)
}
  0x10   :  { %19 = dma.hbm_to_vmem [thread:$0]  %s167_s0, 256, %s17_s13, [#allocation3]  }
  0x11   :  { %110 = dma.done.wait [#allocation3], 256  }
  0x12   :  { %111 = vsyncadd [#allocation3], 4294967040  ;;  %v115_v0 = vmov 0   ;;  %v29_v1 = vld [vmem:[%s168_s1] sm:$0xff]  ;;  %v28_v5 = vld [vmem:[#allocation2 + $0x8] sm:$0xff]  ;;  %s116_s28 = smov [#allocation5]  }
  0x13   :  { %65 = vset.pattern.permute.xlu0 %v115_v0  ;;  %v37_v2 = vld [vmem:[%s169_s2] sm:$0xff]  ;;  %s53_s29 = sshll.u32 %s116_s28, 4  ;;  %s54_s29 = int_to_ptr.vmem [resolvable:$true] %s53_s29 }
  0x14   :  { %32 = vperm.xlu0 %65, %v29_v1   ;;  %v27_v4 = vld [vmem:[#allocation2] sm:$0xff]  ;;  %s88_s0 = scalar_lea.vmem %s54_s29, 256  ;;  %p93_p9 = scmp.lt.s32.totalorder %s54_s29, %s54_s29 }
  0x15   :  { %p89_p8 = scmp.ne.s32.totalorder %s54_s29, %s88_s0  ;;  %p94_p10 = scmp.lt.s32.totalorder %s88_s0, %s88_s0 }
  0x17   :  { %p95_p11 = por %p94_p10, %p93_p9 }
  0x18   :  { %40 = vperm.xlu0 %65, %v37_v2  }
  0x19   :  { %p96_p12 = pnand %p95_p11, %p89_p8 }
  0x93   :  { %v33_v3 = vpop.permute.xlu0 %32 }
  0x94   :  { %v35_v6 = vsub.f32 %v27_v4, %v33_v3  ;;  %v36_v7 = vsub.f32 %v28_v5, %v33_v3 }
  0x97   :  { %v41_v8 = vpop.permute.xlu0 %40 }
  0x98   :  { %v43_v9 = vmul.f32 %v41_v8, %v35_v6  ;;  %v44_v10 = vmul.f32 %v41_v8, %v36_v7 }
  0x9a   :  { %45 = vst [vmem:[#allocation5] sm:$0xff] %v43_v9  ;;  %46 = vst [vmem:[#allocation5 + $0x8] sm:$0xff] %v44_v10 }
  0x9b   :  { %99 = shalt.err (!%p96_p12)
}
  0x9c   :  { %s100_s30 = scalar_lea.hbm %s170_s3, 256 }
  0x9d   :  { %p101_p13 = scmp.ne.s32.totalorder %s170_s3, %s100_s30  ;;  %p104_p0 = scmp.lt.u32.totalorder %s100_s30, %s170_s3 }
  0x9f   :  { %p106_p1 = pnand %p104_p0, %p101_p13 }
  0xa1   :  { %109 = shalt.err (!%p106_p1)
}
  0xa2   :  { %56 = dma.vmem_to_hbm [thread:$0]  %s54_s29, 256, %s170_s3, [#allocation4]  }
  0xa3   :  { %112 = dma.done.wait [#allocation4], 256  }
  0xa4   :  { %113 = vsyncadd [#allocation4], 4294967040 }
  0xa5   :  { %60 = vsyncpa [#allocation3], 1 }
  0xa6   :  { %61 = vsyncpa [#allocation4], 1 }

</bundles_post_ra>
